<compile_context>
chip_gen: v7x
topology: tpu7x:2x2x1
jax: 0.10.0
libtpu: 0.0.40
codegen_flags: <defaults>
</compile_context>

<pallas_src>
import functools

import jax
import jax.numpy as jnp
from jax.experimental import pallas as pl
from jax.experimental.pallas import tpu as pltpu


def _round_up(x: int, m: int) -> int:
    return ((x + m - 1) // m) * m


def _mlp_kernel(x_ref, w1_ref, b1_ref, w2_ref, b2_ref, o_ref):
    # Layer 1: bf16 MXU matmul with f32 accumulation, bias + ReLU in f32 (VPU).
    h = jnp.dot(x_ref[...], w1_ref[...], preferred_element_type=jnp.float32)
    h = jnp.maximum(h + b1_ref[...], 0.0)                      # (TM, Hp) f32
    # Layer 2: cast activations to bf16 for the MXU, accumulate in f32.
    y = jnp.dot(h.astype(jnp.bfloat16), w2_ref[...],
                preferred_element_type=jnp.float32)
    y = y + b2_ref[...]                                        # (TM, Op) f32
    o_ref[...] = y.astype(o_ref.dtype)


@functools.partial(jax.jit, static_argnames=("block_m",))
def net_forward(x, w1, b1, w2, b2, *, block_m: int = 256):
    """relu(x @ W1 + b1) @ W2 + b2.

    x:  (B, F) f32
    w1: (F, H) f32, b1: (1, H) f32   (pre-transposed vs nn.Linear weight)
    w2: (H, O) f32, b2: (1, O) f32
    returns (B, O) f32
    """
    B, F = x.shape
    H = w1.shape[1]
    O = w2.shape[1]

    # Lane-dense padding of hidden / output dims (zeros -> exact results after slice).
    Hp = _round_up(H, 128)
    Op = _round_up(O, 128)
    # Batch tile: >=8 sublanes, capped at block_m; pad B to a multiple of it.
    TM = min(block_m, max(8, _round_up(B, 8)))
    Bp = _round_up(B, TM)

    x_p = jnp.pad(x, ((0, Bp - B), (0, 0))).astype(jnp.bfloat16)          # (Bp, F)
    w1_p = jnp.pad(w1, ((0, 0), (0, Hp - H))).astype(jnp.bfloat16)        # (F, Hp)
    b1_p = jnp.pad(b1, ((0, 0), (0, Hp - H))).astype(jnp.float32)         # (1, Hp)
    w2_p = jnp.pad(w2, ((0, Hp - H), (0, Op - O))).astype(jnp.bfloat16)   # (Hp, Op)
    b2_p = jnp.pad(b2, ((0, 0), (0, Op - O))).astype(jnp.float32)         # (1, Op)

    grid = (Bp // TM,)

    # VMEM budget: 2x (double buffer) each tile, rounded up generously.
    tile_bytes = (
        TM * F * 2 + F * Hp * 2 + 8 * Hp * 4 + Hp * Op * 2 + 8 * Op * 4 + TM * Op * 4
    )
    vmem_limit = int(min(max(4 * tile_bytes, 16 * 1024 * 1024), 64 * 1024 * 1024))

    cost = pl.CostEstimate(
        flops=2 * Bp * F * Hp + 2 * Bp * Hp * Op,
        transcendentals=0,
        bytes_accessed=(x_p.size * 2 + w1_p.size * 2 + w2_p.size * 2
                        + b1_p.size * 4 + b2_p.size * 4 + Bp * Op * 4),
    )

    out_p = pl.pallas_call(
        _mlp_kernel,
        out_shape=jax.ShapeDtypeStruct((Bp, Op), jnp.float32),
        grid=grid,
        in_specs=[
            pl.BlockSpec((TM, F), lambda i: (i, 0)),   # x tile, pipelined over batch
            pl.BlockSpec((F, Hp), lambda i: (0, 0)),   # W1 resident
            pl.BlockSpec((1, Hp), lambda i: (0, 0)),   # b1 resident
            pl.BlockSpec((Hp, Op), lambda i: (0, 0)),  # W2 resident
            pl.BlockSpec((1, Op), lambda i: (0, 0)),   # b2 resident
        ],
        out_specs=pl.BlockSpec((TM, Op), lambda i: (i, 0)),
        compiler_params=pltpu.CompilerParams(
            dimension_semantics=("parallel",),          # megacore sharding on v7x
            vmem_limit_bytes=vmem_limit,
        ),
        cost_estimate=cost,
    )(x_p, w1_p, b1_p, w2_p, b2_p)

    return out_p[:B, :O]


def init_params(key, n_feature, n_hidden, n_output):
    """PyTorch nn.Linear-style init: U(-1/sqrt(fan_in), 1/sqrt(fan_in))."""
    k1, k2, k3, k4 = jax.random.split(key, 4)
    lim1 = 1.0 / jnp.sqrt(jnp.float32(n_feature))
    lim2 = 1.0 / jnp.sqrt(jnp.float32(n_hidden))
    w1 = jax.random.uniform(k1, (n_feature, n_hidden), jnp.float32, -lim1, lim1)
    b1 = jax.random.uniform(k2, (1, n_hidden), jnp.float32, -lim1, lim1)
    w2 = jax.random.uniform(k3, (n_hidden, n_output), jnp.float32, -lim2, lim2)
    b2 = jax.random.uniform(k4, (1, n_output), jnp.float32, -lim2, lim2)
    return w1, b1, w2, b2


if __name__ == "__main__":
    n_feature, n_hidden, n_output = 16, 32, 4
    batch = 8

    key = jax.random.PRNGKey(0)
    kx, kp = jax.random.split(key)
    x = jax.random.normal(kx, (batch, n_feature), jnp.float32)
    w1, b1, w2, b2 = init_params(kp, n_feature, n_hidden, n_output)

    out = net_forward(x, w1, b1, w2, b2)
    out = jax.block_until_ready(out)
    assert out.shape == (batch, n_output)

    # Reference matching the kernel's bf16-MXU / f32-accumulate path.
    h_ref = jnp.maximum(
        jnp.dot(x.astype(jnp.bfloat16), w1.astype(jnp.bfloat16),
                preferred_element_type=jnp.float32) + b1, 0.0)
    ref_bf16 = jnp.dot(h_ref.astype(jnp.bfloat16), w2.astype(jnp.bfloat16),
                       preferred_element_type=jnp.float32) + b2
    assert jnp.allclose(out, ref_bf16, atol=1e-3, rtol=1e-3)

    # Sanity check against the pure-f32 PyTorch-equivalent forward (loose tol: bf16 inputs).
    ref_f32 = jnp.maximum(x @ w1 + b1, 0.0) @ w2 + b2
    assert jnp.allclose(out, ref_f32, atol=5e-2, rtol=5e-2)

    print("KERNEL_OK")
</pallas_src>

<mosaic_0001>
module attributes {stable_mosaic.version = 11 : i64} {
  func.func @_mlp_kernel(%arg0: i32, %arg1: memref<8x16xbf16, #tpu.memory_space<vmem>>, %arg2: memref<16x128xbf16, #tpu.memory_space<vmem>>, %arg3: memref<1x128xf32, #tpu.memory_space<vmem>>, %arg4: memref<128x128xbf16, #tpu.memory_space<vmem>>, %arg5: memref<1x128xf32, #tpu.memory_space<vmem>>, %arg6: memref<8x128xf32, #tpu.memory_space<vmem>>) attributes {dimension_semantics = [#tpu.dimension_semantics<parallel>], iteration_bounds = array<i64: 1>, scalar_prefetch = 0 : i64, scratch_operands = 0 : i64, tpu.core_type = #tpu.core_type<tc>, window_params = [{transform_indices = @transform_0, window_bounds = array<i64: 8, 16>}, {pipeline_mode = #tpu.pipeline_mode<synchronous>, transform_indices = @transform_1, window_bounds = array<i64: 16, 128>}, {pipeline_mode = #tpu.pipeline_mode<synchronous>, transform_indices = @transform_2, window_bounds = array<i64: 1, 128>}, {pipeline_mode = #tpu.pipeline_mode<synchronous>, transform_indices = @transform_3, window_bounds = array<i64: 128, 128>}, {pipeline_mode = #tpu.pipeline_mode<synchronous>, transform_indices = @transform_4, window_bounds = array<i64: 1, 128>}, {transform_indices = @transform_5, window_bounds = array<i64: 8, 128>}]} {
    %c0 = arith.constant 0 : index
    %c0_0 = arith.constant 0 : index
    %0 = vector.load %arg1[%c0, %c0_0] : memref<8x16xbf16, #tpu.memory_space<vmem>>, vector<8x16xbf16>
    %c0_1 = arith.constant 0 : index
    %c0_2 = arith.constant 0 : index
    %1 = vector.load %arg2[%c0_1, %c0_2] : memref<16x128xbf16, #tpu.memory_space<vmem>>, vector<16x128xbf16>
    %cst = arith.constant dense<0.000000e+00> : vector<8x128xf32>
    %2 = tpu.matmul %0, %1, %cst {dimension_numbers = #tpu.dot_dimension_numbers<[1], [0], [0], [1], [0, 0, 1, 1], [], []>} : vector<8x16xbf16>, vector<16x128xbf16>, vector<8x128xf32> -> vector<8x128xf32>
    %c0_3 = arith.constant 0 : index
    %c0_4 = arith.constant 0 : index
    %3 = vector.load %arg3[%c0_3, %c0_4] : memref<1x128xf32, #tpu.memory_space<vmem>>, vector<1x128xf32>
    %4 = vector.broadcast %3 : vector<1x128xf32> to vector<8x128xf32>
    %5 = arith.addf %2, %4 : vector<8x128xf32>
    %cst_5 = arith.constant 0.000000e+00 : f32
    %6 = vector.broadcast %cst_5 : f32 to vector<8x128xf32>
    %7 = arith.maximumf %5, %6 : vector<8x128xf32>
    %8 = arith.truncf %7 : vector<8x128xf32> to vector<8x128xbf16>
    %c0_6 = arith.constant 0 : index
    %c0_7 = arith.constant 0 : index
    %9 = vector.load %arg4[%c0_6, %c0_7] : memref<128x128xbf16, #tpu.memory_space<vmem>>, vector<128x128xbf16>
    %cst_8 = arith.constant dense<0.000000e+00> : vector<8x128xf32>
    %10 = tpu.matmul %8, %9, %cst_8 {dimension_numbers = #tpu.dot_dimension_numbers<[1], [0], [0], [1], [0, 0, 1, 1], [], []>} : vector<8x128xbf16>, vector<128x128xbf16>, vector<8x128xf32> -> vector<8x128xf32>
    %c0_9 = arith.constant 0 : index
    %c0_10 = arith.constant 0 : index
    %11 = vector.load %arg5[%c0_9, %c0_10] : memref<1x128xf32, #tpu.memory_space<vmem>>, vector<1x128xf32>
    %12 = vector.broadcast %11 : vector<1x128xf32> to vector<8x128xf32>
    %13 = arith.addf %10, %12 : vector<8x128xf32>
    %c0_11 = arith.constant 0 : index
    %c0_12 = arith.constant 0 : index
    %14 = vector.load %arg6[%c0_11, %c0_12] : memref<8x128xf32, #tpu.memory_space<vmem>>, vector<8x128xf32>
    tpu.vector_store %arg6[%c0_11, %c0_12], %13 {strides = array<i32>} : memref<8x128xf32, #tpu.memory_space<vmem>>, vector<8x128xf32>,
    return
  }
  func.func @transform_0(%arg0: i32) -> (i32, i32) {
    %c0_i32 = arith.constant 0 : i32
    %c0_i32_0 = arith.constant 0 : i32
    return %arg0, %c0_i32 : i32, i32
  }
  func.func @transform_1(%arg0: i32) -> (i32, i32) {
    %c0_i32 = arith.constant 0 : i32
    %c0_i32_0 = arith.constant 0 : i32
    %c0_i32_1 = arith.constant 0 : i32
    return %c0_i32, %c0_i32_0 : i32, i32
  }
  func.func @transform_2(%arg0: i32) -> (i32, i32) {
    %c0_i32 = arith.constant 0 : i32
    %c0_i32_0 = arith.constant 0 : i32
    %c0_i32_1 = arith.constant 0 : i32
    return %c0_i32, %c0_i32_0 : i32, i32
  }
  func.func @transform_3(%arg0: i32) -> (i32, i32) {
    %c0_i32 = arith.constant 0 : i32
    %c0_i32_0 = arith.constant 0 : i32
    %c0_i32_1 = arith.constant 0 : i32
    return %c0_i32, %c0_i32_0 : i32, i32
  }
  func.func @transform_4(%arg0: i32) -> (i32, i32) {
    %c0_i32 = arith.constant 0 : i32
    %c0_i32_0 = arith.constant 0 : i32
    %c0_i32_1 = arith.constant 0 : i32
    return %c0_i32, %c0_i32_0 : i32, i32
  }
  func.func @transform_5(%arg0: i32) -> (i32, i32) {
    %c0_i32 = arith.constant 0 : i32
    %c0_i32_0 = arith.constant 0 : i32
    return %arg0, %c0_i32 : i32, i32
  }
}

</mosaic_0001>

<bundles_post_ra>
// kernel: net_forward.1
= control target key start
LH: loop header
LB: loop body
LE: loop exit
PB: predicated region body
PF: predicated region fallthrough
CT: control target
= control target key end

     0   :  { %v259_v0 = vmov 0.0   ;;  %vm260_vm0 = vmmov 0   ;;  %vm37_vm1 = vcmask 130048   ;;  %s330_s1 = inlined_call_operand.vmem [shape: bf16[16,128], index: 1, kind: input, shape index: {}]   ;;  %s331_s0 = inlined_call_operand.vmem [shape: bf16[8,16], index: 0, kind: input, shape index: {}]   ;;  %s332_s3 = inlined_call_operand.vmem [shape: bf16[128,128], index: 3, kind: input, shape index: {}]   ;;  %s333_s2 = inlined_call_operand.vmem [shape: f32[1,128], index: 2, kind: input, shape index: {}]   ;;  %s334_s4 = inlined_call_operand.vmem [shape: f32[1,128], index: 4, kind: input, shape index: {}]   ;;  %s335_s5 = inlined_call_operand.vmem [shape: f32[8,128], index: 5, kind: output, shape index: {}]  }
   0x1   :  { %222 = vmatprep.subr.bf16.mxu0 %v259_v0  ;;  %v250_v1 = vld [vmem:[%s330_s1] sm:$0xff]   ;;  %224 = vmatprep.mubr.msk.bf16.mxu0 %vm260_vm0, %v259_v0  ;;  %v252_v4 = vld [vmem:[%s332_s3 + $0x8] sm:$0xff]   ;;  %v253_v5 = vld [vmem:[%s332_s3 + $0x10] sm:$0xff]  }
   0x2   :  { %v21_v2 = vld [vmem:[%s331_s0] sm:$0xf]  ;;  %228 = vmatprep.subr.bf16.mxu1 %v259_v0  ;;  %244 = vmatprep.mubr.msk.bf16.mxu1 %vm260_vm0, %v259_v0  ;;  %v254_v6 = vld [vmem:[%s332_s3 + $0x18] sm:$0xff]   ;;  %v256_v8 = vld [vmem:[%s332_s3 + $0x28] sm:$0xff]  }
   0x3   :  { %223 = vmatpush3.bf16.msra.mxu0 %v250_v1  ;;  %v251_v3 = vld [vmem:[%s332_s3] sm:$0xff]   ;;  %v257_v9 = vld [vmem:[%s332_s3 + $0x30] sm:$0xff]   ;;  %v258_v10 = vld [vmem:[%s332_s3 + $0x38] sm:$0xff]  }
   0x4   :  { %229 = vmatpush3.bf16.msra.mxu1 %v251_v3  ;;  %v255_v7 = vld [vmem:[%s332_s3 + $0x20] sm:$0xff]  }
   0x5   :  { %230 = vmatprep.subr.bf16.mxu1 %v259_v0  ;;  %v199_v11 = vld [vmem:[%s333_s2] ss:$0 sm:$0xff] }
   0x6   :  { %225 = vmatmul.mubr.msk.bf16.vlgmr.msra.gmra.mrb[0].mxu0 %vm37_vm1, %v21_v2  ;;  %v202_v19 = vld [vmem:[%s334_s4] ss:$0 sm:$0xff] }
   0x8   :  { %231 = vmatpush3.bf16.msra.mxu1 %v252_v4 }
   0x9   :  { %232 = vmatprep.subr.bf16.mxu1 %v259_v0 }
   0xc   :  { %233 = vmatpush3.bf16.msra.mxu1 %v253_v5 }
   0xd   :  { %234 = vmatprep.subr.bf16.mxu1 %v259_v0 }
  0x10   :  { %235 = vmatpush3.bf16.msra.mxu1 %v254_v6 }
  0x11   :  { %236 = vmatprep.subr.bf16.mxu1 %v259_v0 }
  0x14   :  { %237 = vmatpush3.bf16.msra.mxu1 %v255_v7 }
  0x15   :  { %238 = vmatprep.subr.bf16.mxu1 %v259_v0 }
  0x18   :  { %239 = vmatpush3.bf16.msra.mxu1 %v256_v8 }
  0x19   :  { %240 = vmatprep.subr.bf16.mxu1 %v259_v0 }
  0x1c   :  { %241 = vmatpush3.bf16.msra.mxu1 %v257_v9 }
  0x1d   :  { %242 = vmatprep.subr.bf16.mxu1 %v259_v0 }
  0x20   :  { %243 = vmatpush3.bf16.msra.mxu1 %v258_v10 }
  0xd9   :  { %v75_v12 = vpop.f32.mrb[0].mxu0 }
  0xda   :  { %v76_v13 = vadd.f32 %v199_v11, %v75_v12  ;;  %v226_v14 = vpop.f32.mrb[1].mxu0 }
  0xdb   :  { %v78_v15 = vpop.f32.mrb[2].mxu0 }
  0xdc   :  { %v81_v16 = vmax.f32 %v76_v13, 0.0  ;;  %v227_v17 = vpop.f32.mrb[3].mxu0 }
  0xde   :  { %v82_v18 = vpack.c.bf16 %v81_v16, %v81_v16 }
  0xe0   :  { %245 = vmatmul.mubr.bf16.vlgmr.msra.gmra.mrb[0].mxu1 %v82_v18 }
 0x1b3   :  { %v188_v20 = vpop.f32.mrb[0].mxu1 }
 0x1b4   :  { %v189_v21 = vadd.f32 %v202_v19, %v188_v20  ;;  %v246_v22 = vpop.f32.mrb[1].mxu1 }
 0x1b5   :  { %v191_v23 = vpop.f32.mrb[2].mxu1 }
 0x1b6   :  { %194 = vst [vmem:[%s335_s5] sm:$0xff] %v189_v21  ;;  %v247_v24 = vpop.f32.mrb[3].mxu1 }

</bundles_post_ra>
